<compile_context>
chip_gen: v7x
topology: tpu7x:2x2x1
jax: 0.10.0
libtpu: 0.0.40
codegen_flags: <defaults>
</compile_context>

<pallas_src>
import functools

import jax
import jax.numpy as jnp
import numpy as np
from jax import lax
from jax.experimental import pallas as pl
from jax.experimental.pallas import tpu as pltpu

_VMEM_LIMIT_BYTES = 48 * 1024 * 1024      # conservative: fits v7x's 64 MiB physical VMEM
_X_TILE_TARGET_BYTES = 2 * 1024 * 1024    # ~2 MiB f32 row tiles: near HBM roofline
_ONE_HOT_BUDGET_BYTES = 4 * 1024 * 1024   # cap the [Bp, tile_rows] one-hot temporary
_MAX_TILE_ROWS = 32 * 1024


def _round_up(x, m):
    return ((x + m - 1) // m) * m


def _cdiv(a, b):
    return -(-a // b)


# ----------------------------------------------------------------------------------
# Pass 1: per-segment sum / sum-of-squares accumulation (grid = (halves, row tiles))
# ----------------------------------------------------------------------------------
def _stats_kernel(starts_ref, ends_ref, x_ref, sum_ref, sq_ref, *,
                  tile_rows, n_rows, blocks_per_half):
    h = pl.program_id(0)
    t = pl.program_id(1)

    @pl.when(t == 0)
    def _():
        sum_ref[...] = jnp.zeros_like(sum_ref)
        sq_ref[...] = jnp.zeros_like(sq_ref)

    # Logical (unclamped) global row base of this tile.  For clamped duplicate /
    # ragged-tail rows, base + iota >= n_rows, so both the mask and the one-hot are 0.
    base = (h * blocks_per_half + t) * tile_rows

    xf = x_ref[...].astype(jnp.float32)                                   # [TR, C]
    row_s = base + lax.broadcasted_iota(jnp.int32, (tile_rows, 1), 0)     # [TR, 1]
    xm = jnp.where(row_s < n_rows, xf, 0.0)          # kill OOB garbage/NaN before MXU

    row_l = base + lax.broadcasted_iota(jnp.int32, (1, tile_rows), 1)     # [1, TR]
    # One-hot segment membership, already transposed: [Bp, TR].
    oh_t = ((row_l >= starts_ref[...]) & (row_l < ends_ref[...])).astype(jnp.float32)

    # MXU reductions: [Bp, TR] @ [TR, C] -> [Bp, C], accumulated in the resident output.
    sum_ref[...] += jnp.dot(oh_t, xm, preferred_element_type=jnp.float32)
    sq_ref[...] += jnp.dot(oh_t, xm * xm, preferred_element_type=jnp.float32)


# ----------------------------------------------------------------------------------
# Pass 2: y = x * scale[seg] + shift[seg], one store per row (grid over row tiles)
# ----------------------------------------------------------------------------------
def _norm_kernel(starts_ref, ends_ref, scale_ref, shift_ref, x_ref, o_ref, *, tile_rows):
    base = pl.program_id(0) * tile_rows
    row = base + lax.broadcasted_iota(jnp.int32, (tile_rows, 1), 0)       # [TR, 1]
    # One-hot gather matrix: [TR, Bp]; every in-range row selects exactly one segment.
    oh = ((row >= starts_ref[...]) & (row < ends_ref[...])).astype(jnp.float32)
    scale_r = jnp.dot(oh, scale_ref[...], preferred_element_type=jnp.float32)  # [TR, C]
    shift_r = jnp.dot(oh, shift_ref[...], preferred_element_type=jnp.float32)  # [TR, C]
    y = x_ref[...].astype(jnp.float32) * scale_r + shift_r
    o_ref[...] = y.astype(o_ref.dtype)


# ----------------------------------------------------------------------------------
# Wrapper
# ----------------------------------------------------------------------------------
def segment_layer_norm(x, offsets, weight=None, bias=None, *,
                       eps=1e-5, elementwise_affine=True, tile_rows=None):
    """x: [N, C]; offsets: [B] cumulative segment end indices (offsets[-1] == N),
    same convention as the PyTorch module (the leading 0 is added internally)."""
    x = jnp.asarray(x)                       # streamed in native dtype (no wrapper cast)
    N, C = x.shape
    offsets = jnp.asarray(offsets, jnp.int32)
    B = offsets.shape[0]

    # ---- segment boundary vectors (CSR with implicit leading 0), padded -----------
    Bp = _round_up(max(B, 8), 8)
    last = offsets[-1]
    pad_b = Bp - B
    starts = jnp.concatenate([jnp.zeros((1,), jnp.int32), offsets[:-1],
                              jnp.full((pad_b,), last, jnp.int32)])
    ends = jnp.concatenate([offsets, jnp.full((pad_b,), last, jnp.int32)])
    counts = (ends - starts).astype(jnp.float32).reshape(Bp, 1)
    inv_cnt = 1.0 / jnp.maximum(counts, 1.0)
    starts_col, ends_col = starts.reshape(Bp, 1), ends.reshape(Bp, 1)
    starts_row, ends_row = starts.reshape(1, Bp), ends.reshape(1, Bp)

    # ---- row tiling: ~2 MiB tiles, bounded by the one-hot temporary ---------------
    if tile_rows is None:
        tr = _X_TILE_TARGET_BYTES // (4 * C)
        tr = min(tr, _ONE_HOT_BUDGET_BYTES // (4 * Bp), _MAX_TILE_ROWS)
        tile_rows = max(tr, 8)
    tile_rows = _round_up(min(tile_rows, _round_up(N, 8)), 8)
    num_blocks = _cdiv(N, tile_rows)
    last_block = num_blocks - 1

    # Two halves so v7x's two TensorCores split pass 1; serial (and ~free) on v5e/v6e.
    H = 2 if num_blocks >= 2 else 1
    T = _cdiv(num_blocks, H)

    # ---- pass 1: per-segment partial sums / sums of squares -----------------------
    stats_kernel = functools.partial(_stats_kernel, tile_rows=tile_rows,
                                     n_rows=N, blocks_per_half=T)
    part_sum, part_sq = pl.pallas_call(
        stats_kernel,
        out_shape=(jax.ShapeDtypeStruct((H * Bp, C), jnp.float32),
                   jax.ShapeDtypeStruct((H * Bp, C), jnp.float32)),
        grid=(H, T),
        in_specs=[
            pl.BlockSpec((Bp, 1), lambda h, t: (0, 0)),          # segment starts (col)
            pl.BlockSpec((Bp, 1), lambda h, t: (0, 0)),          # segment ends   (col)
            pl.BlockSpec((tile_rows, C),                         # x row tile
                         lambda h, t: (jnp.minimum(h * T + t, last_block), 0)),
        ],
        out_specs=(pl.BlockSpec((Bp, C), lambda h, t: (h, 0)),   # per-half sum acc
                   pl.BlockSpec((Bp, C), lambda h, t: (h, 0))),  # per-half sumsq acc
        compiler_params=pltpu.CompilerParams(
            dimension_semantics=("parallel", "arbitrary"),
            vmem_limit_bytes=_VMEM_LIMIT_BYTES),
    )(starts_col, ends_col, x)

    # ---- tiny XLA epilogue: combine halves, finalize stats, fold affine -----------
    seg_sum = part_sum.reshape(H, Bp, C).sum(axis=0)
    seg_sq = part_sq.reshape(H, Bp, C).sum(axis=0)
    mean = seg_sum * inv_cnt
    var = jnp.maximum(seg_sq * inv_cnt - mean * mean, 0.0)
    inv_std = lax.rsqrt(var + eps)
    if elementwise_affine:
        w = jnp.asarray(weight, jnp.float32).reshape(1, C)
        b = jnp.asarray(bias, jnp.float32).reshape(1, C)
        scale = inv_std * w
        shift = b - mean * scale
    else:
        scale = inv_std
        shift = -mean * scale

    # ---- pass 2: normalize + affine (as a single FMA), one store per row ----------
    norm_kernel = functools.partial(_norm_kernel, tile_rows=tile_rows)
    out = pl.pallas_call(
        norm_kernel,
        out_shape=jax.ShapeDtypeStruct((N, C), x.dtype),
        grid=(num_blocks,),
        in_specs=[
            pl.BlockSpec((1, Bp), lambda t: (0, 0)),             # segment starts (row)
            pl.BlockSpec((1, Bp), lambda t: (0, 0)),             # segment ends   (row)
            pl.BlockSpec((Bp, C), lambda t: (0, 0)),             # per-segment scale
            pl.BlockSpec((Bp, C), lambda t: (0, 0)),             # per-segment shift
            pl.BlockSpec((tile_rows, C), lambda t: (t, 0)),      # x row tile
        ],
        out_specs=pl.BlockSpec((tile_rows, C), lambda t: (t, 0)),
        compiler_params=pltpu.CompilerParams(
            dimension_semantics=("parallel",),                   # megacore-sharded
            vmem_limit_bytes=_VMEM_LIMIT_BYTES),
    )(starts_row, ends_row, scale, shift, x)

    return out


# ----------------------------------------------------------------------------------
# Pure-JAX reference mirroring the torch_scatter implementation
# ----------------------------------------------------------------------------------
def _reference(x, offsets, weight, bias, eps=1e-5):
    N, C = x.shape
    indptr = jnp.concatenate([jnp.zeros((1,), jnp.int32), offsets.astype(jnp.int32)])
    seg_ids = jnp.searchsorted(indptr[1:], jnp.arange(N), side="right")
    B = offsets.shape[0]
    counts = jax.ops.segment_sum(jnp.ones((N,), jnp.float32), seg_ids, num_segments=B)
    counts = jnp.maximum(counts, 1.0)[:, None]
    mean = jax.ops.segment_sum(x, seg_ids, num_segments=B) / counts
    mean_g = mean[seg_ids]
    var = jax.ops.segment_sum((x - mean_g) ** 2, seg_ids, num_segments=B) / counts
    std_g = jnp.sqrt(var + eps)[seg_ids]
    return (x - mean_g) / std_g * weight[None, :] + bias[None, :]


if __name__ == "__main__":
    key = jax.random.PRNGKey(0)
    k_x, k_w, k_b = jax.random.split(key, 3)

    N, C, B = 64, 32, 4
    x = jax.random.normal(k_x, (N, C), dtype=jnp.float32)
    # Cumulative segment end indices (the PyTorch module's `offsets` argument).
    offsets = jnp.array([10, 25, 48, 64], dtype=jnp.int32)
    weight = 1.0 + 0.1 * jax.random.normal(k_w, (C,), dtype=jnp.float32)
    bias = 0.1 * jax.random.normal(k_b, (C,), dtype=jnp.float32)

    ref = _reference(x, offsets, weight, bias, eps=1e-5)

    # Multi-tile, even block count (two-half stats split, no clamped tail).
    out = jax.block_until_ready(
        segment_layer_norm(x, offsets, weight, bias, eps=1e-5, tile_rows=16))
    np.testing.assert_allclose(np.asarray(out), np.asarray(ref), atol=2e-5, rtol=2e-5)

    # Odd block count + ragged final tile (exercises the clamp / in-kernel mask path).
    out = jax.block_until_ready(
        segment_layer_norm(x, offsets, weight, bias, eps=1e-5, tile_rows=24))
    np.testing.assert_allclose(np.asarray(out), np.asarray(ref), atol=2e-5, rtol=2e-5)

    # Auto-sized tile path (single large tile at this problem size).
    out = jax.block_until_ready(
        segment_layer_norm(x, offsets, weight, bias, eps=1e-5))
    np.testing.assert_allclose(np.asarray(out), np.asarray(ref), atol=2e-5, rtol=2e-5)

    # No-affine path.
    ref_na = _reference(x, offsets, jnp.ones((C,), jnp.float32),
                        jnp.zeros((C,), jnp.float32), eps=1e-5)
    out = jax.block_until_ready(
        segment_layer_norm(x, offsets, eps=1e-5, elementwise_affine=False, tile_rows=16))
    np.testing.assert_allclose(np.asarray(out), np.asarray(ref_na), atol=2e-5, rtol=2e-5)

    print("KERNEL_OK")
</pallas_src>

<mosaic_0001>
module attributes {stable_mosaic.version = 11 : i64} {
  func.func @_stats_kernel(%arg0: i32, %arg1: i32, %arg2: memref<8x1xi32, #tpu.memory_space<vmem>>, %arg3: memref<8x1xi32, #tpu.memory_space<vmem>>, %arg4: memref<16x32xf32, #tpu.memory_space<vmem>>, %arg5: memref<8x32xf32, #tpu.memory_space<vmem>>, %arg6: memref<8x32xf32, #tpu.memory_space<vmem>>) attributes {dimension_semantics = [#tpu.dimension_semantics<parallel>, #tpu.dimension_semantics<arbitrary>], iteration_bounds = array<i64: 2, 2>, scalar_prefetch = 0 : i64, scratch_operands = 0 : i64, tpu.core_type = #tpu.core_type<tc>, window_params = [{pipeline_mode = #tpu.pipeline_mode<synchronous>, transform_indices = @transform_0, window_bounds = array<i64: 8, 1>}, {pipeline_mode = #tpu.pipeline_mode<synchronous>, transform_indices = @transform_1, window_bounds = array<i64: 8, 1>}, {transform_indices = @transform_2, window_bounds = array<i64: 16, 32>}, {transform_indices = @transform_3, window_bounds = array<i64: 8, 32>}, {transform_indices = @transform_4, window_bounds = array<i64: 8, 32>}]} {
    %c0_i32 = arith.constant 0 : i32
    %0 = arith.cmpi eq, %arg1, %c0_i32 : i32
    %1 = arith.extui %0 : i1 to i32
    %c0_i32_0 = arith.constant 0 : i32
    %2 = arith.cmpi ne, %1, %c0_i32_0 : i32
    scf.if %2 {
      %cst_16 = arith.constant 0.000000e+00 : f32
      %39 = vector.broadcast %cst_16 : f32 to vector<8x32xf32>
      %c0_17 = arith.constant 0 : index
      %c0_18 = arith.constant 0 : index
      %40 = vector.load %arg5[%c0_17, %c0_18] : memref<8x32xf32, #tpu.memory_space<vmem>>, vector<8x32xf32>
      tpu.vector_store %arg5[%c0_17, %c0_18], %39 {strides = array<i32>} : memref<8x32xf32, #tpu.memory_space<vmem>>, vector<8x32xf32>,
      %cst_19 = arith.constant 0.000000e+00 : f32
      %41 = vector.broadcast %cst_19 : f32 to vector<8x32xf32>
      %c0_20 = arith.constant 0 : index
      %c0_21 = arith.constant 0 : index
      %42 = vector.load %arg6[%c0_20, %c0_21] : memref<8x32xf32, #tpu.memory_space<vmem>>, vector<8x32xf32>
      tpu.vector_store %arg6[%c0_20, %c0_21], %41 {strides = array<i32>} : memref<8x32xf32, #tpu.memory_space<vmem>>, vector<8x32xf32>,
    } else {
    }
    %c2_i32 = arith.constant 2 : i32
    %3 = arith.muli %arg0, %c2_i32 : i32
    %4 = arith.addi %3, %arg1 : i32
    %c16_i32 = arith.constant 16 : i32
    %5 = arith.muli %4, %c16_i32 : i32
    %c0 = arith.constant 0 : index
    %c0_1 = arith.constant 0 : index
    %6 = vector.load %arg4[%c0, %c0_1] : memref<16x32xf32, #tpu.memory_space<vmem>>, vector<16x32xf32>
    %7 = tpu.iota {dimensions = array<i32: 0>} : vector<16x1xi32>
    %8 = vector.broadcast %5 : i32 to vector<16x1xi32>
    %9 = arith.addi %8, %7 : vector<16x1xi32>
    %c64_i32 = arith.constant 64 : i32
    %10 = vector.broadcast %c64_i32 : i32 to vector<16x1xi32>
    %11 = arith.cmpi slt, %9, %10 : vector<16x1xi32>
    %cst = arith.constant 0.000000e+00 : f32
    %12 = vector.shape_cast %11 : vector<16x1xi1> to vector<16x1xi1>
    %13 = vector.broadcast %12 : vector<16x1xi1> to vector<16x32xi1>
    %14 = vector.broadcast %cst : f32 to vector<16x32xf32>
    %15 = arith.select %13, %6, %14 : vector<16x32xi1>, vector<16x32xf32>
    %16 = tpu.iota {dimensions = array<i32: 1>} : vector<1x16xi32>
    %17 = vector.broadcast %5 : i32 to vector<1x16xi32>
    %18 = arith.addi %17, %16 : vector<1x16xi32>
    %c0_2 = arith.constant 0 : index
    %c0_3 = arith.constant 0 : index
    %19 = vector.load %arg2[%c0_2, %c0_3] : memref<8x1xi32, #tpu.memory_space<vmem>>, vector<8x1xi32>
    %20 = vector.broadcast %18 : vector<1x16xi32> to vector<8x16xi32>
    %21 = vector.broadcast %19 : vector<8x1xi32> to vector<8x16xi32>
    %22 = arith.cmpi sge, %20, %21 : vector<8x16xi32>
    %c0_4 = arith.constant 0 : index
    %c0_5 = arith.constant 0 : index
    %23 = vector.load %arg3[%c0_4, %c0_5] : memref<8x1xi32, #tpu.memory_space<vmem>>, vector<8x1xi32>
    %24 = vector.broadcast %18 : vector<1x16xi32> to vector<8x16xi32>
    %25 = vector.broadcast %23 : vector<8x1xi32> to vector<8x16xi32>
    %26 = arith.cmpi slt, %24, %25 : vector<8x16xi32>
    %27 = arith.andi %22, %26 : vector<8x16xi1>
    %28 = arith.extui %27 : vector<8x16xi1> to vector<8x16xi32>
    %29 = arith.sitofp %28 : vector<8x16xi32> to vector<8x16xf32>
    %c0_6 = arith.constant 0 : index
    %c0_7 = arith.constant 0 : index
    %30 = vector.load %arg5[%c0_6, %c0_7] : memref<8x32xf32, #tpu.memory_space<vmem>>, vector<8x32xf32>
    %cst_8 = arith.constant dense<0.000000e+00> : vector<8x32xf32>
    %31 = tpu.matmul %29, %15, %cst_8 {dimension_numbers = #tpu.dot_dimension_numbers<[1], [0], [0], [1], [0, 0, 1, 1], [], []>} : vector<8x16xf32>, vector<16x32xf32>, vector<8x32xf32> -> vector<8x32xf32>
    %32 = arith.addf %30, %31 : vector<8x32xf32>
    %c0_9 = arith.constant 0 : index
    %c0_10 = arith.constant 0 : index
    %33 = vector.load %arg5[%c0_9, %c0_10] : memref<8x32xf32, #tpu.memory_space<vmem>>, vector<8x32xf32>
    tpu.vector_store %arg5[%c0_9, %c0_10], %32 {strides = array<i32>} : memref<8x32xf32, #tpu.memory_space<vmem>>, vector<8x32xf32>,
    %c0_11 = arith.constant 0 : index
    %c0_12 = arith.constant 0 : index
    %34 = vector.load %arg6[%c0_11, %c0_12] : memref<8x32xf32, #tpu.memory_space<vmem>>, vector<8x32xf32>
    %35 = arith.mulf %15, %15 : vector<16x32xf32>
    %cst_13 = arith.constant dense<0.000000e+00> : vector<8x32xf32>
    %36 = tpu.matmul %29, %35, %cst_13 {dimension_numbers = #tpu.dot_dimension_numbers<[1], [0], [0], [1], [0, 0, 1, 1], [], []>} : vector<8x16xf32>, vector<16x32xf32>, vector<8x32xf32> -> vector<8x32xf32>
    %37 = arith.addf %34, %36 : vector<8x32xf32>
    %c0_14 = arith.constant 0 : index
    %c0_15 = arith.constant 0 : index
    %38 = vector.load %arg6[%c0_14, %c0_15] : memref<8x32xf32, #tpu.memory_space<vmem>>, vector<8x32xf32>
    tpu.vector_store %arg6[%c0_14, %c0_15], %37 {strides = array<i32>} : memref<8x32xf32, #tpu.memory_space<vmem>>, vector<8x32xf32>,
    return
  }
  func.func @transform_0(%arg0: i32, %arg1: i32) -> (i32, i32) {
    %c0_i32 = arith.constant 0 : i32
    %c0_i32_0 = arith.constant 0 : i32
    %c0_i32_1 = arith.constant 0 : i32
    return %c0_i32, %c0_i32_0 : i32, i32
  }
  func.func @transform_1(%arg0: i32, %arg1: i32) -> (i32, i32) {
    %c0_i32 = arith.constant 0 : i32
    %c0_i32_0 = arith.constant 0 : i32
    %c0_i32_1 = arith.constant 0 : i32
    return %c0_i32, %c0_i32_0 : i32, i32
  }
  func.func @transform_2(%arg0: i32, %arg1: i32) -> (i32, i32) {
    %c2_i32 = arith.constant 2 : i32
    %0 = arith.muli %arg0, %c2_i32 : i32
    %1 = arith.addi %0, %arg1 : i32
    %c3_i32 = arith.constant 3 : i32
    %2 = arith.minsi %1, %c3_i32 : i32
    %c0_i32 = arith.constant 0 : i32
    %c0_i32_0 = arith.constant 0 : i32
    return %2, %c0_i32 : i32, i32
  }
  func.func @transform_3(%arg0: i32, %arg1: i32) -> (i32, i32) {
    %c0_i32 = arith.constant 0 : i32
    %c0_i32_0 = arith.constant 0 : i32
    return %arg0, %c0_i32 : i32, i32
  }
  func.func @transform_4(%arg0: i32, %arg1: i32) -> (i32, i32) {
    %c0_i32 = arith.constant 0 : i32
    %c0_i32_0 = arith.constant 0 : i32
    return %arg0, %c0_i32 : i32, i32
  }
}

</mosaic_0001>

<bundles_post_ra>
// kernel: tpu_custom_call.1
= control target key start
LH: loop header
LB: loop body
LE: loop exit
PB: predicated region body
PF: predicated region fallthrough
CT: control target
= control target key end

     0   :  { %10 = vsyncpa [#allocation3], 0  ;;  %s1057_s0 = inlined_call_operand.vmem [shape: s32[8,1], index: 0, kind: input, shape index: {}]   ;;  %s1058_s1 = inlined_call_operand.vmem [shape: s32[8,1], index: 1, kind: input, shape index: {}]   ;;  %s1059_s2 = inlined_call_operand.vmem [shape: f32[64,32], index: 2, kind: input, shape index: {}]   ;;  %s1060_s3 = inlined_call_operand.hbm [shape: f32[16,32], index: 3, kind: output, shape index: {0}]   ;;  %s1061_s4 = inlined_call_operand.hbm [shape: f32[16,32], index: 4, kind: output, shape index: {1}]  }
   0x1   :  { %12 = vsyncpa [#allocation3 + $0x1], 0 }
   0x2   :  { %13 = vsyncpa [#allocation5], 0 }
   0x3   :  { %15 = vsyncpa [#allocation5 + $0x1], 0  ;;  %s873_s15 = smov 0   ;;  %s875_s16 = smov 0  }
   0x4   :  { %s877_s17 = smov 0   ;;  %s879_s18 = smov 0  }
   0x5   :  { %s881_s19 = smov 0   ;;  %s883_s20 = smov 0  }
   0x6   :  { %s885_s21 = smov 0   ;;  %s887_s22 = smov 0  }
   0x7 LB: > { %s578_s23 = sadd.s32 4294967295, %s839_s22   ;;  %s579_s24 = sadd.s32 4294967294, %s839_s22   ;;  %s839_s22 = sphi %s887_s22, %s21_s22   ;;  %s835_s21 = sphi %s885_s21, %s1070_s21   ;;  %s831_s20 = sphi %s883_s20, %s1069_s20   ;;  %s827_s19 = sphi %s881_s19, %s1068_s19   ;;  %s823_s18 = sphi %s879_s18, %s1067_s18   ;;  %s819_s17 = sphi %s877_s17, %s1066_s17   ;;  %s815_s16 = sphi %s875_s16, %s1065_s16   ;;  %s811_s15 = sphi %s873_s15, %s1064_s15  }
   0x8   : > { %s30_s25 = sadd.s32 1, %s831_s20  ;;  %s33_s26 = sadd.s32 1, %s835_s21 }
   0x9   : > { %p31_p0 = scmp.ge.s32.totalorder %s30_s25, 2  ;;  %p126_p1 = scmp.ne.s32.totalorder %s819_s17, %s815_s16 }
   0xa   : > { %p127_p2 = scmp.eq.s32.totalorder %s578_s23, 3  ;;  %p132_p4 = scmp.ne.s32.totalorder %s815_s16, %s811_s15 }
   0xb   : > { %s1072_s25 = smov (%p31_p0, %s30_s25), 0  ;;  %s1074_s26 = smov (!%p31_p0, %s33_s26), %s835_s21 }
   0xc   : > { %p922_p3 = por %p127_p2, %p126_p1  ;;  %p35_p5 = scmp.ge.s32.totalorder %s1074_s26, 2 }
   0xd   : > { %p133_p6 = scmp.eq.s32.totalorder %s579_s24, 3  ;;  %p584_p7 = scmp.ge.s32.totalorder %s839_s22, 1 }
   0xe   : > { %p200_p8 = scmp.lt.s32.totalorder %s839_s22, 5  ;;  %s1076_s26 = smov (%p35_p5, %s1074_s26), 0 }
   0xf   : > { %p932_p9 = por %p133_p6, %p132_p4  ;;  %s113_s29 = ssub.s32 %s835_s21, %s1076_s26 }
  0x10   : > { %p201_p10 = pnand %p584_p7, %p200_p8  ;;  %s116_s30 = sadd.s32 1, %s819_s17 }
  0x11   : > { %p114_p11 = scmp.eq.s32.totalorder %s113_s29, 0  ;;  %s943_s6 = sand.u32 (!%p201_p10), 1, %s815_s16  }
  0x12   : > { %204 = sbr.rel (%p201_p10) target bundleno = 421 (0x1a5), region = 32  ;;  %s587_s7 = sshll.u32 (!%p201_p10), %s827_s19, 1 }
  0x13   : > { %s940_s5 = scalar_select %p114_p11, %s819_s17, %s116_s30  }
  0x14   : > { %s585_s8 = sshll.u32 (!%p201_p10), %s943_s6, 3  ;;  %s236_s9 = sadd.s32 (!%p201_p10), %s823_s18, %s587_s7 }
  0x15   : > { %p237_p12 = scmp.lt.s32.totalorder (!%p201_p10), %s236_s9, 3  ;;  %s951_s24 = scalar_lea.vmem (!%p201_p10), [#allocation2], %s585_s8 }
  0x16   : > { %s953_s29 = scalar_lea.vmem (!%p201_p10), [#allocation4], %s585_s8  ;;  %p590_p0 = scmp.ne.s32.totalorder (!%p201_p10), %s823_s18, 0 }
  0x19   : > { %s238_s10 = scalar_select %p237_p12, %s236_s9, 3 }
  0x1a   : > { %252 = sbr.rel (%p590_p0) target bundleno = 33 (0x21), region = 36  ;;  %vm253_vm0 = vcmask (!%p590_p0), 261120   ;;  %v841_v0 = vmov (!%p590_p0), 0.0  }
  0x1b   : > { %s588_s11 = sshll.u32 %s238_s10, 1  ;;  %254 = vst.msk [vmem:[%s951_s24] sm:$0xff] (!%p590_p0), %vm253_vm0, %v841_v0  ;;  %255 = vst.msk [vmem:[%s953_s29] sm:$0xff] (!%p590_p0), %vm253_vm0, %v841_v0 }
  0x1c   : > { %p240_p13 = scmp.lt.s32.totalorder %s588_s11, 7 }
  0x1e   : > { %s1078_s11 = smov (!%p240_p13, %s588_s11), 7 }
  0x1f   : > { %s589_s12 = sshll.u32 %s1078_s11, 3 }
  0x20   : > { %s243_s23 = scalar_lea.vmem %s1059_s2, %s589_s12 }
  0x21 PF: > { %v278_v1 = vld [vmem:[%s1057_s0] sm:$0xff]  ;;  %s592_s10 = sshll.u32 %s236_s9, 4  ;;  %v261_v2 = vlaneseq  ;;  %v842_v3 = vmov 0   ;;  %v843_v8 = vmov 0.0|0.0   ;;  %v260_v13 = vld [vmem:[%s243_s23 + $0x8] sm:$0xff]  ;;  %vm844_vm3 = vmmov 0  }
  0x22   : > { %712 = vset.pattern.permute.xlu0 %v842_v3  ;;  %v264_v4 = vstv %s592_s10  ;;  %v283_v7 = vld [vmem:[%s1058_s1] sm:$0xff]  ;;  %624 = vmatprep.subr.bf16.mxu0 %v843_v8  ;;  %v845_v18 = vmov 0.0   ;;  %vm292_vm7 = vcmask 130048   ;;  %s600_s9 = sshll.u32 %s827_s19, 7  ;;  %v369_v26 = vld [vmem:[%s953_s29] sm:$0xff]  ;;  %s463_s11 = sshll.u32 %s951_s24, 4  ;;  %s974_s11 = int_to_ptr.vmem [resolvable:$true] %s463_s11 }
  0x23   : > { %280 = vperm.xlu0 %712, %v278_v1   ;;  %v276_v5 = vand.u32 127, %v261_v2  ;;  %v262_v6 = vshrl.u32 %v261_v2, 7  ;;  %628 = vmatprep.subr.bf16.mxu1 %v843_v8  ;;  %v259_v10 = vld [vmem:[%s243_s23] sm:$0xff]  ;;  %s476_s12 = sshll.u32 %s953_s29, 4  ;;  %vm367_vm9 = vcmask 261120   ;;  %s972_s23 = scalar_lea.hbm %s1060_s3, %s600_s9  ;;  %s981_s12 = int_to_ptr.vmem [resolvable:$true] %s476_s12 }
  0x24   : > { %v625_v15 = vpack.c.bf16 %v260_v13, %v259_v10  ;;  %614 = vmatprep.mubr.msk.f32.mxu0 %vm844_vm3, %v845_v18  ;;  %621 = vmatprep.mubr.msk.f32.mxu1 %vm844_vm3, %v845_v18  ;;  %v291_v25 = vld [vmem:[%s951_s24] sm:$0xff]  ;;  %s979_s7 = scalar_lea.hbm %s1061_s4, %s600_s9  ;;  %s445_s10 = scalar_lea.sflag [#allocation3], %s943_s6 }
  0x25   : > { %v277_v9 = vadd.s32 %v276_v5, %v264_v4  ;;  %v263_v11 = vadd.s32 8, %v262_v6  ;;  %v265_v12 = vadd.s32 %v264_v4, %v262_v6  ;;  %s713_s18 = scalar_lea.vmem %s974_s11, 128  ;;  %s846_s8 = smov [#allocation2]  }
  0x26   : > { %p714_p1 = scmp.ne.s32.totalorder %s974_s11, %s713_s18  ;;  %s717_s13 = sshll.u32 %s846_s8, 4  ;;  %s718_s13 = int_to_ptr.vmem [resolvable:$false] %s717_s13 }
  0x27   : > { %285 = vperm.xlu0 %712, %v283_v7   ;;  %v266_v14 = vadd.s32 %v264_v4, %v263_v11  ;;  %vm267_vm1 = vcmp.lt.s32.totalorder %v265_v12, 64  ;;  %s719_s14 = scalar_lea.vmem %s718_s13, 256  ;;  %p720_p5 = scmp.lt.s32.totalorder %s974_s11, %s718_s13 }
  0x28   : > { %v273_v16 = vsel %vm267_vm1, %v259_v10, 0.0  ;;  %p715_p2 = pnand %p714_p1, %p922_p3  ;;  %p721_p6 = scmp.lt.s32.totalorder %s719_s14, %s713_s18 }
  0x29   : > { %vm268_vm2 = vcmp.lt.s32.totalorder %v266_v14, 64  ;;  %v370_v17 = vmul.f32 %v273_v16, %v273_v16 }
  0x2a   : > { %vm626_vm4 = vmpackc.low %vm268_vm2, %vm267_vm1  ;;  %v274_v19 = vsel %vm268_vm2, %v260_v13, 0.0  ;;  %p716_p4 = pneg %p715_p2  ;;  %p722_p7 = por %p721_p6, %p720_p5 }
  0x2b   : > { %627 = vmatpush3.bf16.msk.msra.mxu0 %vm626_vm4, %v625_v15  ;;  %v371_v20 = vmul.f32 %v274_v19, %v274_v19 }
  0x2c   : > { %p723_p8 = pnand %p722_p7, %p716_p4 }
  0x2d   : > { %v629_v21 = vpack.c.bf16 %v371_v20, %v370_v17 }
  0x2f   : > { %630 = vmatpush3.bf16.msra.mxu1 %v629_v21 }
  0xa2   : > { %v281_v22 = vpop.permute.xlu0 %280 }
  0xa3   : > { %vm282_vm5 = vcmp.ge.s32.totalorder %v277_v9, %v281_v22 }
  0xa6   : > { %v286_v23 = vpop.permute.xlu0 %285 }
  0xa7   : > { %vm287_vm6 = vcmp.lt.s32.totalorder %v277_v9, %v286_v23 }
  0xa8   : > { %vm288_vm8 = vmand %vm282_vm5, %vm287_vm6 }
  0xa9   : > { %v593_v24 = vsel %vm288_vm8, 1.0, %v845_v18 }
  0xaa   : > { %615 = vmatmul.mubr.msk.f32.vlgmr.msra.gmra.mrb[0].mxu0 %vm292_vm7, %v593_v24  ;;  %622 = vmatmul.mubr.msk.f32.vlgmr.msra.gmra.mrb[0].mxu1 %vm292_vm7, %v593_v24 }
 0x17d   : > { %v362_v27 = vpop.f32.mrb[0].mxu0  ;;  %v438_v28 = vpop.f32.mrb[0].mxu1 }
 0x17e   : > { %v366_v29 = vadd.f32 %v362_v27, %v291_v25  ;;  %v442_v30 = vadd.f32 %v438_v28, %v369_v26  ;;  %v616_v31 = vpop.f32.mrb[1].mxu0  ;;  %v623_v32 = vpop.f32.mrb[1].mxu1 }
 0x180   : > { %368 = vst.msk [vmem:[%s951_s24] sm:$0xff] %vm367_vm9, %v366_v29  ;;  %443 = vst.msk [vmem:[%s953_s29] sm:$0xff] %vm367_vm9, %v442_v30 }
 0x181   : > { %726 = shalt.err (!%p723_p8)
}
 0x182   : > { %s727_s24 = scalar_lea.hbm %s972_s23, 128  ;;  %s731_s19 = scalar_lea.hbm %s1060_s3, 256 }
 0x183   : > { %p728_p10 = scmp.ne.s32.totalorder %s972_s23, %s727_s24  ;;  %p732_p13 = scmp.lt.u32.totalorder %s972_s23, %s1060_s3 }
 0x184   : > { %p733_p0 = scmp.lt.u32.totalorder %s731_s19, %s727_s24  ;;  %p735_p2 = scmp.lt.u32.totalorder %s727_s24, %s972_s23 }
 0x185   : > { %p729_p11 = pnand %p728_p10, %p922_p3 }
 0x186   : > { %p734_p1 = por %p733_p0, %p732_p13 }
 0x187   : > { %p730_p12 = pneg %p729_p11 }
 0x188   : > { %p736_p4 = por %p735_p2, %p734_p1 }
 0x18a   : > { %p737_p5 = pnand %p736_p4, %p730_p12 }
 0x18c   : > { %740 = shalt.err (!%p737_p5)
}
 0x18d   : > { %631 = dma.vmem_to_hbm [thread:$0]  (%p922_p3), %s974_s11, 128, %s972_s23, %s445_s10  }
 0x18e   : > { %s450_s18 = scalar_lea.sflag [#allocation5], %s943_s6  ;;  %s741_s13 = scalar_lea.vmem %s981_s12, 128 }
 0x18f   : > { %p742_p6 = scmp.ne.s32.totalorder %s981_s12, %s741_s13  ;;  %s847_s14 = smov [#allocation4]  }
 0x190   : > { %s745_s24 = sshll.u32 %s847_s14, 4  ;;  %s746_s24 = int_to_ptr.vmem [resolvable:$false] %s745_s24 }
 0x191   : > { %p743_p7 = pnand %p742_p6, %p922_p3  ;;  %s747_s29 = scalar_lea.vmem %s746_s24, 256 }
 0x192   : > { %p748_p10 = scmp.lt.s32.totalorder %s981_s12, %s746_s24  ;;  %p749_p11 = scmp.lt.s32.totalorder %s747_s29, %s741_s13 }
 0x193   : > { %p744_p8 = pneg %p743_p7 }
 0x194   : > { %p750_p12 = por %p749_p11, %p748_p10 }
 0x196   : > { %p751_p13 = pnand %p750_p12, %p744_p8 }
 0x198   : > { %754 = shalt.err (!%p751_p13)
}
 0x199   : > { %s755_s6 = scalar_lea.hbm %s979_s7, 128  ;;  %s759_s10 = scalar_lea.hbm %s1061_s4, 256 }
 0x19a   : > { %p756_p0 = scmp.ne.s32.totalorder %s979_s7, %s755_s6  ;;  %p760_p4 = scmp.lt.u32.totalorder %s979_s7, %s1061_s4 }
 0x19b   : > { %p761_p5 = scmp.lt.u32.totalorder %s759_s10, %s755_s6  ;;  %p763_p7 = scmp.lt.u32.totalorder %s755_s6, %s979_s7 }
 0x19c   : > { %p757_p1 = pnand %p756_p0, %p922_p3 }
 0x19d   : > { %p762_p6 = por %p761_p5, %p760_p4 }
 0x19e   : > { %p758_p2 = pneg %p757_p1 }
 0x19f   : > { %p764_p8 = por %p763_p7, %p762_p6 }
 0x1a1   : > { %p765_p10 = pnand %p764_p8, %p758_p2 }
 0x1a3   : > { %768 = shalt.err (!%p765_p10)
}
 0x1a4   : > { %632 = dma.vmem_to_hbm [thread:$0]  (%p922_p3), %s981_s12, 128, %s979_s7, %s450_s18  }
 0x1a5 PF: > { %p642_p11 = scmp.ge.s32.totalorder %s839_s22, 2  ;;  %s488_s30 = sand.u32 1, %s811_s15  }
 0x1a6   : > { %s489_s8 = scalar_lea.sflag [#allocation3], %s488_s30 }
 0x1a7   : > { %p636_p12 = pnand %p642_p11, %p932_p9 }
 0x1a9   : > { %802 = dma.done.wait (!%p636_p12), %s489_s8, 128  }
 0x1aa   : > { %804 = vsyncadd (!%p636_p12), %s489_s8, 4294967168  ;;  %s498_s13 = scalar_lea.sflag [#allocation5], %s488_s30 }
 0x1ab   : > { %806 = dma.done.wait (!%p636_p12), %s498_s13, 128  }
 0x1ac   : > { %808 = vsyncadd (!%p636_p12), %s498_s13, 4294967168  ;;  %s21_s22 = sadd.s32 1, %s839_s22   ;;  %s1064_s15 = smov %s815_s16 }
 0x1ad   : > { %p18_p13 = scmp.ge.s32.totalorder %s21_s22, 6   ;;  %s1065_s16 = smov %s819_s17 }
 0x1ae   : > { %s1066_s17 = smov %s940_s5  ;;  %s1067_s18 = smov %s831_s20 }
 0x1af   : > { %s1068_s19 = smov %s835_s21  ;;  %s1069_s20 = smov %s1072_s25 }
 0x1b0   : > { %s1070_s21 = smov %s1076_s26  ;;  %20 = sbr.rel (!%p18_p13) target bundleno = 7 (0x7), region = 88 }
 0x1b7   :  { %503 = vsyncpa [#allocation3], 1 }
 0x1b8   :  { %505 = vsyncpa [#allocation3 + $0x1], 1 }
 0x1b9   :  { %506 = vsyncpa [#allocation5], 1 }
 0x1ba   :  { %508 = vsyncpa [#allocation5 + $0x1], 1 }

</bundles_post_ra>
